<compile_context>
chip_gen: v7x
topology: tpu7x:2x2x1
jax: 0.10.0
libtpu: 0.0.40
codegen_flags: <defaults>
</compile_context>

<pallas_src>
import functools

import jax
import jax.numpy as jnp
import numpy as np
from jax.experimental import pallas as pl
from jax.experimental.pallas import tpu as pltpu


def _round_up(x, m):
    return (x + m - 1) // m * m


def _residual_fused_kernel(x_ref, w_ref, e_ref, b_ref, o_ref):
    # x_ref: (TM, Kp)  flattened NCHW rows ((c,h,w) order), zero-padded to Kp lanes
    # w_ref: (Kp, Cp)  fused 1x1+3x3 conv weight, rows in (c,kh,kw) order
    # e_ref: (Cp, Kp)  0/1 expansion matrix: broadcasts h[:, c] over the H*W
    #                  output positions of channel c (PyTorch spatial broadcast)
    # b_ref: (1,  Kp)  fused bias, already broadcast to the (c,h,w) layout
    # o_ref: (TM, Kp)  out = x + broadcast(conv(x)) + bias
    x = x_ref[...].astype(jnp.float32)
    h = jnp.dot(x, w_ref[...], preferred_element_type=jnp.float32)     # (TM, Cp)
    hb = jnp.dot(h, e_ref[...], preferred_element_type=jnp.float32)    # (TM, Kp)
    o_ref[...] = (x + hb + b_ref[...]).astype(o_ref.dtype)


def prepare_residual_block_params(w1, b1, w2, b2, spatial_hw=(3, 3)):
    """One-time host-side weight fusion + padding (NOT in the per-call path).

    w1: (Cm, C, 1, 1), b1: (Cm,), w2: (C, Cm, 3, 3), b2: (C,).
    Returns (w_pad, e_pad, b_pad) ready for residual_block_forward.
    """
    H, W = spatial_hw
    assert H - 2 == 1 and W - 2 == 1, (
        "Residual_Block only type-checks for 3x3 inputs (unpadded 3x3 conv "
        "+ residual broadcast).")
    w1 = np.asarray(w1, np.float32)
    b1 = np.asarray(b1, np.float32)
    w2 = np.asarray(w2, np.float32)
    b2 = np.asarray(b2, np.float32)
    Cm, C = w1.shape[0], w1.shape[1]
    HW = H * W
    K = C * HW
    Kp = _round_up(K, 128)       # lane-dense activation width
    Cp = _round_up(C, 128)       # lane-dense intermediate width

    # Fold the 1x1 conv into the 3x3 conv (no nonlinearity between them):
    #   W_fused[(c,kh,kw), o] = sum_m W1[m,c] * W2[o,m,kh,kw]
    #   b_fused[o]            = b2[o] + sum_{m,kh,kw} b1[m] * W2[o,m,kh,kw]
    # Rows are in (c, kh, kw) order so x.reshape(N, C*H*W) (NCHW) feeds the
    # matmul directly -- no NCHW<->NHWC transposes in the per-call path.
    w1_2d = w1.reshape(Cm, C)
    w_fused = np.einsum("mc,omhw->chwo", w1_2d, w2).reshape(K, C)
    b_fused = b2 + np.einsum("m,omhw->o", b1, w2)                      # (C,)

    # 0/1 expansion matrix realizing the PyTorch spatial broadcast of the
    # (1x1-output) conv result over the H*W positions, in (c,h,w) layout.
    e = np.kron(np.eye(C, dtype=np.float32), np.ones((1, HW), np.float32))
    b_bcast = np.repeat(b_fused, HW)                                   # (K,)

    w_pad = np.zeros((Kp, Cp), np.float32)
    w_pad[:K, :C] = w_fused
    e_pad = np.zeros((Cp, Kp), np.float32)
    e_pad[:C, :K] = e
    b_pad = np.zeros((1, Kp), np.float32)
    b_pad[0, :K] = b_bcast
    return jnp.asarray(w_pad), jnp.asarray(e_pad), jnp.asarray(b_pad)


@functools.partial(jax.jit, static_argnames=("block_rows",))
def residual_block_forward(x_nchw, w_pad, e_pad, b_pad, *, block_rows=512):
    """x_nchw: (N, C, 3, 3); w_pad/e_pad/b_pad from prepare_residual_block_params."""
    N, C, H, W = x_nchw.shape
    K = C * H * W
    Kp, Cp = w_pad.shape

    x_flat = x_nchw.reshape(N, K)                       # NCHW flatten, (c,h,w) order

    # Row tiling: single block for small batches, 512-row parallel grid otherwise.
    if N <= block_rows:
        tm, n_pad = N, 0
    else:
        tm = block_rows
        n_pad = (-N) % tm
    x_padded = jnp.pad(x_flat, ((0, n_pad), (0, Kp - K)))
    np_rows = N + n_pad
    grid = (np_rows // tm,)

    out_padded = pl.pallas_call(
        _residual_fused_kernel,
        out_shape=jax.ShapeDtypeStruct((np_rows, Kp), x_nchw.dtype),
        grid=grid,
        in_specs=[
            pl.BlockSpec((tm, Kp), lambda i: (i, 0)),   # activation tile
            pl.BlockSpec((Kp, Cp), lambda i: (0, 0)),   # resident fused weight
            pl.BlockSpec((Cp, Kp), lambda i: (0, 0)),   # resident expansion matrix
            pl.BlockSpec((1, Kp), lambda i: (0, 0)),    # resident fused bias
        ],
        out_specs=pl.BlockSpec((tm, Kp), lambda i: (i, 0)),
        compiler_params=pltpu.CompilerParams(
            dimension_semantics=("parallel",)),
        input_output_aliases={0: 0},
    )(x_padded, w_pad, e_pad, b_pad)

    return out_padded[:N, :K].reshape(N, C, H, W)


def _ref_forward(x, w1, b1, w2, b2):
    """Pure-JAX reference matching the PyTorch module exactly."""
    dn = ("NCHW", "OIHW", "NCHW")
    t = jax.lax.conv_general_dilated(x, w1, (1, 1), "VALID", dimension_numbers=dn)
    t = t + b1[None, :, None, None]
    h = jax.lax.conv_general_dilated(t, w2, (1, 1), "VALID", dimension_numbers=dn)
    h = h + b2[None, :, None, None]
    return x + h


if __name__ == "__main__":
    channels = 8
    n_blocks = 3           # __init__ overwrites self.blocks -> net effect is 1 block
    mid_channels = channels // 2
    N, H, W = 2, 3, 3      # H = W = 3 forced by unpadded 3x3 conv + residual add

    key = jax.random.PRNGKey(0)
    kx, k1, k2, k3, k4 = jax.random.split(key, 5)
    x = jax.random.normal(kx, (N, channels, H, W), jnp.float32)
    w1 = jax.random.normal(k1, (mid_channels, channels, 1, 1), jnp.float32) * 0.1
    b1 = jax.random.normal(k2, (mid_channels,), jnp.float32) * 0.1
    w2 = jax.random.normal(k3, (channels, mid_channels, 3, 3), jnp.float32) * 0.1
    b2 = jax.random.normal(k4, (channels,), jnp.float32) * 0.1

    # One-time weight fusion (per model), outside the per-call path.
    w_pad, e_pad, b_pad = prepare_residual_block_params(w1, b1, w2, b2, (H, W))

    out = residual_block_forward(x, w_pad, e_pad, b_pad)
    out = jax.block_until_ready(out)

    ref = _ref_forward(x, w1, b1, w2, b2)
    np.testing.assert_allclose(np.asarray(out), np.asarray(ref), rtol=1e-5, atol=1e-5)
    print("KERNEL_OK")
</pallas_src>

<mosaic_0001>
module attributes {stable_mosaic.version = 11 : i64} {
  func.func @_residual_fused_kernel(%arg0: i32, %arg1: memref<2x128xf32, #tpu.memory_space<vmem>>, %arg2: memref<128x128xf32, #tpu.memory_space<vmem>>, %arg3: memref<128x128xf32, #tpu.memory_space<vmem>>, %arg4: memref<1x128xf32, #tpu.memory_space<vmem>>, %arg5: memref<2x128xf32, #tpu.memory_space<vmem>>) attributes {dimension_semantics = [#tpu.dimension_semantics<parallel>], iteration_bounds = array<i64: 1>, scalar_prefetch = 0 : i64, scratch_operands = 0 : i64, tpu.core_type = #tpu.core_type<tc>, window_params = [{transform_indices = @transform_0, window_bounds = array<i64: 2, 128>}, {pipeline_mode = #tpu.pipeline_mode<synchronous>, transform_indices = @transform_1, window_bounds = array<i64: 128, 128>}, {pipeline_mode = #tpu.pipeline_mode<synchronous>, transform_indices = @transform_2, window_bounds = array<i64: 128, 128>}, {pipeline_mode = #tpu.pipeline_mode<synchronous>, transform_indices = @transform_3, window_bounds = array<i64: 1, 128>}, {transform_indices = @transform_4, window_bounds = array<i64: 2, 128>}]} {
    %c0 = arith.constant 0 : index
    %c0_0 = arith.constant 0 : index
    %0 = vector.load %arg1[%c0, %c0_0] : memref<2x128xf32, #tpu.memory_space<vmem>>, vector<2x128xf32>
    %c0_1 = arith.constant 0 : index
    %c0_2 = arith.constant 0 : index
    %1 = vector.load %arg2[%c0_1, %c0_2] : memref<128x128xf32, #tpu.memory_space<vmem>>, vector<128x128xf32>
    %cst = arith.constant dense<0.000000e+00> : vector<2x128xf32>
    %2 = tpu.matmul %0, %1, %cst {dimension_numbers = #tpu.dot_dimension_numbers<[1], [0], [0], [1], [0, 0, 1, 1], [], []>} : vector<2x128xf32>, vector<128x128xf32>, vector<2x128xf32> -> vector<2x128xf32>
    %c0_3 = arith.constant 0 : index
    %c0_4 = arith.constant 0 : index
    %3 = vector.load %arg3[%c0_3, %c0_4] : memref<128x128xf32, #tpu.memory_space<vmem>>, vector<128x128xf32>
    %cst_5 = arith.constant dense<0.000000e+00> : vector<2x128xf32>
    %4 = tpu.matmul %2, %3, %cst_5 {dimension_numbers = #tpu.dot_dimension_numbers<[1], [0], [0], [1], [0, 0, 1, 1], [], []>} : vector<2x128xf32>, vector<128x128xf32>, vector<2x128xf32> -> vector<2x128xf32>
    %5 = arith.addf %0, %4 : vector<2x128xf32>
    %c0_6 = arith.constant 0 : index
    %c0_7 = arith.constant 0 : index
    %6 = vector.load %arg4[%c0_6, %c0_7] : memref<1x128xf32, #tpu.memory_space<vmem>>, vector<1x128xf32>
    %7 = vector.broadcast %6 : vector<1x128xf32> to vector<2x128xf32>
    %8 = arith.addf %5, %7 : vector<2x128xf32>
    %c0_8 = arith.constant 0 : index
    %c0_9 = arith.constant 0 : index
    %9 = vector.load %arg5[%c0_8, %c0_9] : memref<2x128xf32, #tpu.memory_space<vmem>>, vector<2x128xf32>
    tpu.vector_store %arg5[%c0_8, %c0_9], %8 {strides = array<i32>} : memref<2x128xf32, #tpu.memory_space<vmem>>, vector<2x128xf32>,
    return
  }
  func.func @transform_0(%arg0: i32) -> (i32, i32) {
    %c0_i32 = arith.constant 0 : i32
    %c0_i32_0 = arith.constant 0 : i32
    return %arg0, %c0_i32 : i32, i32
  }
  func.func @transform_1(%arg0: i32) -> (i32, i32) {
    %c0_i32 = arith.constant 0 : i32
    %c0_i32_0 = arith.constant 0 : i32
    %c0_i32_1 = arith.constant 0 : i32
    return %c0_i32, %c0_i32_0 : i32, i32
  }
  func.func @transform_2(%arg0: i32) -> (i32, i32) {
    %c0_i32 = arith.constant 0 : i32
    %c0_i32_0 = arith.constant 0 : i32
    %c0_i32_1 = arith.constant 0 : i32
    return %c0_i32, %c0_i32_0 : i32, i32
  }
  func.func @transform_3(%arg0: i32) -> (i32, i32) {
    %c0_i32 = arith.constant 0 : i32
    %c0_i32_0 = arith.constant 0 : i32
    %c0_i32_1 = arith.constant 0 : i32
    return %c0_i32, %c0_i32_0 : i32, i32
  }
  func.func @transform_4(%arg0: i32) -> (i32, i32) {
    %c0_i32 = arith.constant 0 : i32
    %c0_i32_0 = arith.constant 0 : i32
    return %arg0, %c0_i32 : i32, i32
  }
}

</mosaic_0001>

<bundles_post_ra>
// kernel: residual_block_forward.1
= control target key start
LH: loop header
LB: loop body
LE: loop exit
PB: predicated region body
PF: predicated region fallthrough
CT: control target
= control target key end

     0   :  { %9 = vsyncpa [#allocation3], 0  ;;  %s402_s15 = smov [#allocation2]   ;;  %s518_s0 = inlined_call_operand.vmem [shape: f32[2,128], index: 0, kind: input, shape index: {}, may-alias: {0,4}]   ;;  %s519_s1 = inlined_call_operand.vmem [shape: f32[128,128], index: 1, kind: input, shape index: {}]   ;;  %s520_s2 = inlined_call_operand.hbm [shape: f32[128,128], index: 2, kind: input, shape index: {}]   ;;  %s521_s3 = inlined_call_operand.vmem [shape: f32[1,128], index: 3, kind: input, shape index: {}]   ;;  %s522_s4 = inlined_call_operand.vmem [shape: f32[2,128], index: 4, kind: output, shape index: {}, may-alias: {0,4}]  }
   0x1   :  { %s19_s16 = sshll.u32 %s402_s15, 4  ;;  %s378_s19 = scalar_lea.hbm %s520_s2, 2048  ;;  %s20_s16 = int_to_ptr.vmem [resolvable:$true] %s19_s16 }
   0x2   :  { %p379_p0 = scmp.ne.s32.totalorder %s520_s2, %s378_s19  ;;  %p382_p1 = scmp.lt.u32.totalorder %s378_s19, %s520_s2 }
   0x4   :  { %p384_p2 = pnand %p382_p1, %p379_p0 }
   0x6   :  { %387 = shalt.err (!%p384_p2)
}
   0x7   :  { %s388_s24 = scalar_lea.vmem %s20_s16, 2048  ;;  %p393_p4 = scmp.lt.s32.totalorder %s20_s16, %s20_s16 }
   0x8   :  { %p389_p3 = scmp.ne.s32.totalorder %s20_s16, %s388_s24  ;;  %p394_p5 = scmp.lt.s32.totalorder %s388_s24, %s388_s24 }
   0xa   :  { %p395_p6 = por %p394_p5, %p393_p4 }
   0xc   :  { %p396_p7 = pnand %p395_p6, %p389_p3 }
   0xe   :  { %399 = shalt.err (!%p396_p7)
}
   0xf   :  { %s403_s25 = smov 128   ;;  %s404_s26 = smov 8  }
  0x10   :  { %25 = dma.hbm_to_vmem [thread:$0]  %s520_s2, 2048, %s20_s16, [#allocation3], %s403_s25, %s403_s25, %s404_s26  }
  0x11   :  { %400 = dma.done.wait [#allocation3], 2048  }
  0x12   :  { %401 = vsyncadd [#allocation3], 4294965248  ;;  %v405_v0 = vmov 0.0|0.0   ;;  %vm406_vm0 = vmmov 0   ;;  %v407_v1 = vmov 0.0   ;;  %v32_v2 = vld [vmem:[%s519_s1] sm:$0xff] }
  0x13   :  { %324 = vmatprep.subr.bf16.mxu0 %v405_v0  ;;  %286 = vmatprep.mubr.msk.f32.mxu0 %vm406_vm0, %v407_v1  ;;  %v33_v3 = vld [vmem:[%s519_s1 + $0x8] sm:$0xff]  ;;  %v34_v4 = vld [vmem:[%s519_s1 + $0x10] sm:$0xff]  ;;  %v35_v6 = vld [vmem:[%s519_s1 + $0x18] sm:$0xff] }
  0x14   :  { %348 = vmatprep.subr.bf16.mxu1 %v405_v0  ;;  %321 = vmatprep.mubr.msk.f32.mxu1 %vm406_vm0, %v407_v1  ;;  %v325_v5 = vpack.c.bf16 %v33_v3, %v32_v2  ;;  %v328_v7 = vpack.c.bf16 %v35_v6, %v34_v4  ;;  %v36_v8 = vld [vmem:[%s519_s1 + $0x20] sm:$0xff]  ;;  %v37_v9 = vld [vmem:[%s519_s1 + $0x28] sm:$0xff]  ;;  %v120_v12 = vld [vmem:[#allocation2 + $0x10] sm:$0xff] }
  0x15   :  { %v118_v10 = vld [vmem:[#allocation2] sm:$0xff]  ;;  %v119_v11 = vld [vmem:[#allocation2 + $0x8] sm:$0xff]  ;;  %v121_v13 = vld [vmem:[#allocation2 + $0x18] sm:$0xff]  ;;  %v331_v14 = vpack.c.bf16 %v37_v9, %v36_v8 }
  0x16   :  { %326 = vmatpush3.bf16.msra.mxu0 %v325_v5  ;;  %v349_v15 = vpack.c.bf16 %v119_v11, %v118_v10  ;;  %v38_v16 = vld [vmem:[%s519_s1 + $0x30] sm:$0xff]  ;;  %v39_v17 = vld [vmem:[%s519_s1 + $0x38] sm:$0xff]  ;;  %v352_v18 = vpack.c.bf16 %v121_v13, %v120_v12  ;;  %v122_v19 = vld [vmem:[#allocation2 + $0x20] sm:$0xff] }
  0x17   :  { %327 = vmatprep.subr.bf16.mxu0 %v405_v0  ;;  %v123_v20 = vld [vmem:[#allocation2 + $0x28] sm:$0xff]  ;;  %v334_v21 = vpack.c.bf16 %v39_v17, %v38_v16  ;;  %v40_v22 = vld [vmem:[%s519_s1 + $0x40] sm:$0xff]  ;;  %v124_v25 = vld [vmem:[#allocation2 + $0x30] sm:$0xff] }
  0x18   :  { %350 = vmatpush3.bf16.msra.mxu1 %v349_v15  ;;  %v41_v23 = vld [vmem:[%s519_s1 + $0x48] sm:$0xff]  ;;  %v355_v24 = vpack.c.bf16 %v123_v20, %v122_v19  ;;  %v125_v26 = vld [vmem:[#allocation2 + $0x38] sm:$0xff]  ;;  %v42_v28 = vld [vmem:[%s519_s1 + $0x50] sm:$0xff] }
  0x19   :  { %351 = vmatprep.subr.bf16.mxu1 %v405_v0  ;;  %v337_v27 = vpack.c.bf16 %v41_v23, %v40_v22  ;;  %v43_v29 = vld [vmem:[%s519_s1 + $0x58] sm:$0xff]  ;;  %v358_v30 = vpack.c.bf16 %v125_v26, %v124_v25  ;;  %v126_v31 = vld [vmem:[#allocation2 + $0x40] sm:$0xff]  ;;  %v127_v32 = vld [vmem:[#allocation2 + $0x48] sm:$0xff] }
  0x1a   :  { %329 = vmatpush3.bf16.msra.mxu0 %v328_v7  ;;  %v340_v33 = vpack.c.bf16 %v43_v29, %v42_v28  ;;  %v44_v34 = vld [vmem:[%s519_s1 + $0x60] sm:$0xff]  ;;  %v45_v35 = vld [vmem:[%s519_s1 + $0x68] sm:$0xff]  ;;  %v361_v36 = vpack.c.bf16 %v127_v32, %v126_v31  ;;  %v128_v37 = vld [vmem:[#allocation2 + $0x50] sm:$0xff] }
  0x1b   :  { %330 = vmatprep.subr.bf16.mxu0 %v405_v0  ;;  %v129_v38 = vld [vmem:[#allocation2 + $0x58] sm:$0xff]  ;;  %v343_v39 = vpack.c.bf16 %v45_v35, %v44_v34  ;;  %v46_v40 = vld [vmem:[%s519_s1 + $0x70] sm:$0xff]  ;;  %v130_v43 = vld [vmem:[#allocation2 + $0x60] sm:$0xff] }
  0x1c   :  { %353 = vmatpush3.bf16.msra.mxu1 %v352_v18  ;;  %v47_v41 = vld [vmem:[%s519_s1 + $0x78] sm:$0xff]  ;;  %v364_v42 = vpack.c.bf16 %v129_v38, %v128_v37  ;;  %v131_v44 = vld [vmem:[#allocation2 + $0x68] sm:$0xff]  ;;  %v132_v47 = vld [vmem:[#allocation2 + $0x70] sm:$0xff] }
  0x1d   :  { %354 = vmatprep.subr.bf16.mxu1 %v405_v0  ;;  %v346_v45 = vpack.c.bf16 %v47_v41, %v46_v40  ;;  %v367_v46 = vpack.c.bf16 %v131_v44, %v130_v43  ;;  %v133_v48 = vld [vmem:[#allocation2 + $0x78] sm:$0xff]  ;;  %v31_v49 = vld [vmem:[%s518_s0] sm:$0x3] }
  0x1e   :  { %332 = vmatpush3.bf16.msra.mxu0 %v331_v14  ;;  %v370_v50 = vpack.c.bf16 %v133_v48, %v132_v47  ;;  %v219_v54 = vld [vmem:[%s521_s3] ss:$0 sm:$0xff] }
  0x1f   :  { %333 = vmatprep.subr.bf16.mxu0 %v405_v0 }
  0x20   :  { %356 = vmatpush3.bf16.msra.mxu1 %v355_v24 }
  0x21   :  { %357 = vmatprep.subr.bf16.mxu1 %v405_v0 }
  0x22   :  { %335 = vmatpush3.bf16.msra.mxu0 %v334_v21 }
  0x23   :  { %336 = vmatprep.subr.bf16.mxu0 %v405_v0 }
  0x24   :  { %359 = vmatpush3.bf16.msra.mxu1 %v358_v30 }
  0x25   :  { %360 = vmatprep.subr.bf16.mxu1 %v405_v0 }
  0x26   :  { %338 = vmatpush3.bf16.msra.mxu0 %v337_v27 }
  0x27   :  { %339 = vmatprep.subr.bf16.mxu0 %v405_v0 }
  0x28   :  { %362 = vmatpush3.bf16.msra.mxu1 %v361_v36 }
  0x29   :  { %363 = vmatprep.subr.bf16.mxu1 %v405_v0 }
  0x2a   :  { %341 = vmatpush3.bf16.msra.mxu0 %v340_v33 }
  0x2b   :  { %342 = vmatprep.subr.bf16.mxu0 %v405_v0 }
  0x2c   :  { %365 = vmatpush3.bf16.msra.mxu1 %v364_v42 }
  0x2d   :  { %366 = vmatprep.subr.bf16.mxu1 %v405_v0 }
  0x2e   :  { %344 = vmatpush3.bf16.msra.mxu0 %v343_v39 }
  0x2f   :  { %345 = vmatprep.subr.bf16.mxu0 %v405_v0 }
  0x30   :  { %368 = vmatpush3.bf16.msra.mxu1 %v367_v46 }
  0x31   :  { %369 = vmatprep.subr.bf16.mxu1 %v405_v0 }
  0x32   :  { %347 = vmatpush3.bf16.msra.mxu0 %v346_v45 }
  0x34   :  { %371 = vmatpush3.bf16.msra.mxu1 %v370_v50 }
  0x35   :  { %287 = vmatmul.mubr.f32.vlgmr.msra.gmra.mrb[0].mxu0 %v31_v49 }
 0x108   :  { %v114_v51 = vpop.f32.mrb[0].mxu0 }
 0x109   :  { %v288_v52 = vpop.f32.mrb[1].mxu0  ;;  %322 = vmatmul.mubr.f32.vlgmr.msra.gmra.mrb[0].mxu1 %v114_v51 }
 0x1dc   :  { %v200_v53 = vpop.f32.mrb[0].mxu1 }
 0x1dd   :  { %v204_v55 = vadd.f32 %v200_v53, %v31_v49  ;;  %v323_v56 = vpop.f32.mrb[1].mxu1 }
 0x1df   :  { %v212_v57 = vadd.f32 %v219_v54, %v204_v55 }
 0x1e1   :  { %213 = vst [vmem:[%s522_s4] sm:$0x3] %v212_v57 }
 0x1e2   :  { %218 = vsyncpa [#allocation3], 1 }

</bundles_post_ra>
